<compile_context>
chip_gen: v7x
topology: tpu7x:2x2x1
jax: 0.10.0
libtpu: 0.0.40
codegen_flags: <defaults>
</compile_context>

<pallas_src>
import functools

import jax
import jax.numpy as jnp
from jax.experimental import pallas as pl
from jax.experimental.pallas import tpu as pltpu

BN_EPS = 1e-5
LANE = 128


def _round_up(a, b):
    return ((a + b - 1) // b) * b


def _vmem_budget(*byte_counts):
    # 2x headroom over the double-buffered working set, clamped to a safe range
    # (v7x physical VMEM is only 64 MiB, so stay well below it).
    need = int(sum(byte_counts))
    return int(min(max(2 * need, 16 << 20), 48 << 20))


# ---------------------------------------------------------------------------
# Pass 1: edge_feat = B * (H^T @ (X @ Theta)),   residual = X @ W_skip
# ---------------------------------------------------------------------------
def _pass1_kernel(x_ref, h_ref, wcat_ref, b_ref,
                  edge_ref, resid_ref, acc_ref, *, f_out_pad):
    i = pl.program_id(0)

    @pl.when(i == 0)
    def _():
        acc_ref[...] = jnp.zeros_like(acc_ref)

    # Single fused X contraction for both Theta and W_skip (wider, lane-denser MXU output).
    xw = jnp.dot(x_ref[...], wcat_ref[...], preferred_element_type=jnp.float32)
    resid_ref[...] = xw[:, f_out_pad:]
    feat = xw[:, :f_out_pad].astype(jnp.bfloat16)

    # H^T @ feat without materializing the transpose: contract the node (sublane) axis
    # of both operands directly on the MXU (bf16 inputs, f32 accumulation).
    acc_ref[...] += jax.lax.dot_general(
        h_ref[...], feat,
        dimension_numbers=(((0,), (0,)), ((), ())),
        preferred_element_type=jnp.float32)

    @pl.when(i == pl.num_programs(0) - 1)
    def _():
        # Apply the hyperedge-degree normalization B once, write bf16 for pass 2's MXU.
        edge_ref[...] = (acc_ref[...] * b_ref[...]).astype(edge_ref.dtype)


# ---------------------------------------------------------------------------
# Pass 2: out = scale * D * (H @ edge_feat) + residual + shift
# ---------------------------------------------------------------------------
def _pass2_kernel(h_ref, edge_ref, resid_ref, d_ref, scale_ref, shift_ref, out_ref):
    agg = jnp.dot(h_ref[...], edge_ref[...], preferred_element_type=jnp.float32)
    out_ref[...] = agg * d_ref[...] * scale_ref[...] + resid_ref[...] + shift_ref[...]


# ---------------------------------------------------------------------------
# Wrapper
# ---------------------------------------------------------------------------
def hgnn_layer_forward(x, hyperedge_index, hyperedge_attr, params, num_edges,
                       *, tile_n=256):
    """x: (N, F_in) f32; hyperedge_index: (2, nnz) int32; hyperedge_attr unused (no attention).

    tile_n: node-tile size. 256 is sized for v5e/v6e (128 MiB VMEM); on v7x (64 MiB) prefer 128.
    """
    del hyperedge_attr  # only consumed by HypergraphConv when use_attention=True
    N, f_in = x.shape
    f_out = params["theta"].shape[1]
    E = int(num_edges)

    # Lane-dense padded shapes.
    f_in_p = _round_up(f_in, LANE)
    f_out_p = _round_up(f_out, LANE)
    e_p = _round_up(E, LANE)
    n8 = _round_up(N, 8)
    tn = min(tile_n, n8)
    n_p = _round_up(N, tn)
    n_tiles = n_p // tn

    # ---- wrapper-side glue: dense incidence, degree norms, folded BN / biases ----
    # Note: duplicate (node, edge) pairs accumulate via .add, matching PyG's scatter semantics.
    node_idx, edge_idx = hyperedge_index[0], hyperedge_index[1]
    H = jnp.zeros((n_p, e_p), jnp.float32).at[node_idx, edge_idx].add(1.0)

    deg_e = jnp.sum(H, axis=0).reshape(e_p, 1)
    deg_n = jnp.sum(H, axis=1).reshape(n_p, 1)
    b_edge = jnp.where(deg_e > 0, 1.0 / jnp.maximum(deg_e, 1.0), 0.0)   # (E_pad, 1)
    d_node = jnp.where(deg_n > 0, 1.0 / jnp.maximum(deg_n, 1.0), 0.0)   # (N_pad, 1)
    H = H.astype(jnp.bfloat16)   # 0/1 incidence exact in bf16; halves HBM/VMEM bytes

    x_p = jnp.zeros((n_p, f_in_p), jnp.float32).at[:N, :f_in].set(x)

    def pad2(a, rows, cols):
        return jnp.zeros((rows, cols), jnp.float32).at[:a.shape[0], :a.shape[1]].set(a)

    theta_p = pad2(params["theta"], f_in_p, f_out_p)
    wskip_p = pad2(params["w_skip"], f_in_p, f_out_p)
    w_cat = jnp.concatenate([theta_p, wskip_p], axis=1)                 # (F_in_pad, 2*F_out_pad)

    # Fold BatchNorm(eval) + hgnn bias + skip bias into one scale/shift pair.
    scale = params["gamma"] * jax.lax.rsqrt(params["running_var"] + BN_EPS)
    shift = (params["hgnn_bias"] - params["running_mean"]) * scale \
        + params["beta"] + params["b_skip"]
    scale_p = pad2(scale, 1, f_out_p)
    shift_p = pad2(shift, 1, f_out_p)

    # ----------------------------- Pass 1 -----------------------------
    vmem1 = _vmem_budget(
        2 * tn * f_in_p * 4,            # x tiles (double-buffered)
        2 * tn * e_p * 2,               # H tiles (bf16)
        2 * f_in_p * 2 * f_out_p * 4,   # fused weight
        2 * e_p * 4,                    # B vector
        2 * e_p * f_out_p * 2,          # edge_feat output (bf16)
        2 * tn * f_out_p * 4,           # residual output tiles
        e_p * f_out_p * 4,              # f32 accumulator scratch
    )

    edge_feat, resid = pl.pallas_call(
        functools.partial(_pass1_kernel, f_out_pad=f_out_p),
        grid=(n_tiles,),
        in_specs=[
            pl.BlockSpec((tn, f_in_p), lambda i: (i, 0)),
            pl.BlockSpec((tn, e_p), lambda i: (i, 0)),
            pl.BlockSpec((f_in_p, 2 * f_out_p), lambda i: (0, 0)),
            pl.BlockSpec((e_p, 1), lambda i: (0, 0)),
        ],
        out_specs=[
            pl.BlockSpec((e_p, f_out_p), lambda i: (0, 0)),   # VMEM-resident accumulator
            pl.BlockSpec((tn, f_out_p), lambda i: (i, 0)),
        ],
        out_shape=[
            jax.ShapeDtypeStruct((e_p, f_out_p), jnp.bfloat16),
            jax.ShapeDtypeStruct((n_p, f_out_p), jnp.float32),
        ],
        scratch_shapes=[pltpu.VMEM((e_p, f_out_p), jnp.float32)],
        compiler_params=pltpu.CompilerParams(
            dimension_semantics=("arbitrary",),    # node axis is a reduction for edge_feat
            vmem_limit_bytes=vmem1),
    )(x_p, H, w_cat, b_edge)

    # ----------------------------- Pass 2 -----------------------------
    vmem2 = _vmem_budget(
        2 * tn * e_p * 2,               # H tiles (bf16)
        2 * e_p * f_out_p * 2,          # edge_feat (bf16)
        2 * tn * f_out_p * 4,           # residual tiles
        2 * tn * 4,                     # D vector tiles
        4 * f_out_p * 4,                # scale + shift
        2 * tn * f_out_p * 4,           # output tiles
    )

    out_p = pl.pallas_call(
        _pass2_kernel,
        grid=(n_tiles,),
        in_specs=[
            pl.BlockSpec((tn, e_p), lambda i: (i, 0)),
            pl.BlockSpec((e_p, f_out_p), lambda i: (0, 0)),
            pl.BlockSpec((tn, f_out_p), lambda i: (i, 0)),
            pl.BlockSpec((tn, 1), lambda i: (i, 0)),
            pl.BlockSpec((1, f_out_p), lambda i: (0, 0)),
            pl.BlockSpec((1, f_out_p), lambda i: (0, 0)),
        ],
        out_specs=pl.BlockSpec((tn, f_out_p), lambda i: (i, 0)),
        out_shape=jax.ShapeDtypeStruct((n_p, f_out_p), jnp.float32),
        compiler_params=pltpu.CompilerParams(
            dimension_semantics=("parallel",),     # independent node tiles -> megacore split
            vmem_limit_bytes=vmem2),
    )(H, edge_feat, resid, d_node, scale_p, shift_p)

    return out_p[:N, :f_out]


# ---------------------------------------------------------------------------
# Pure-JAX reference (f32, untiled) for validation
# ---------------------------------------------------------------------------
def hgnn_layer_reference(x, hyperedge_index, hyperedge_attr, params, num_edges):
    del hyperedge_attr
    N = x.shape[0]
    node_idx, edge_idx = hyperedge_index[0], hyperedge_index[1]
    H = jnp.zeros((N, num_edges), jnp.float32).at[node_idx, edge_idx].add(1.0)
    feat = x @ params["theta"]
    deg_e = H.sum(axis=0)
    deg_n = H.sum(axis=1)
    B = jnp.where(deg_e > 0, 1.0 / jnp.maximum(deg_e, 1.0), 0.0)
    D = jnp.where(deg_n > 0, 1.0 / jnp.maximum(deg_n, 1.0), 0.0)
    edge_feat = (H.T @ feat) * B[:, None]
    node_feat = (H @ edge_feat) * D[:, None] + params["hgnn_bias"]
    inv_std = jax.lax.rsqrt(params["running_var"] + BN_EPS)
    bn = (node_feat - params["running_mean"]) * inv_std * params["gamma"] + params["beta"]
    residual = x @ params["w_skip"] + params["b_skip"]
    return bn + residual


def make_params(key, f_in, f_out):
    k1, k2, k3, k4, k5, k6 = jax.random.split(key, 6)
    return {
        # HypergraphConv: lin weight stored transposed as (F_in, F_out), plus bias.
        "theta": jax.random.normal(k1, (f_in, f_out), jnp.float32) * (1.0 / jnp.sqrt(f_in)),
        "hgnn_bias": jax.random.normal(k2, (1, f_out), jnp.float32) * 0.01,
        # BatchNorm1d parameters / running stats (eval mode).
        "gamma": 1.0 + 0.1 * jax.random.normal(k3, (1, f_out), jnp.float32),
        "beta": 0.1 * jax.random.normal(k4, (1, f_out), jnp.float32),
        "running_mean": jnp.zeros((1, f_out), jnp.float32),
        "running_var": jnp.ones((1, f_out), jnp.float32),
        # skip_connection Linear(F_in, F_out), weight stored transposed as (F_in, F_out).
        "w_skip": jax.random.normal(k5, (f_in, f_out), jnp.float32) * (1.0 / jnp.sqrt(f_in)),
        "b_skip": jax.random.normal(k6, (1, f_out), jnp.float32) * 0.01,
    }


if __name__ == "__main__":
    key = jax.random.PRNGKey(0)
    k_x, k_n, k_e, k_p, k_attr = jax.random.split(key, 5)

    N, E, F_IN, F_OUT, NNZ = 16, 8, 16, 32, 24

    x = jax.random.normal(k_x, (N, F_IN), jnp.float32)
    node_idx = jax.random.randint(k_n, (NNZ,), 0, N, jnp.int32)
    edge_idx = jax.random.randint(k_e, (NNZ,), 0, E, jnp.int32)
    hyperedge_index = jnp.stack([node_idx, edge_idx], axis=0)           # (2, NNZ)
    hyperedge_attr = jax.random.normal(k_attr, (E, F_IN), jnp.float32)  # unused (no attention)

    params = make_params(k_p, F_IN, F_OUT)

    out = hgnn_layer_forward(x, hyperedge_index, hyperedge_attr, params, num_edges=E)
    jax.block_until_ready(out)
    assert out.shape == (N, F_OUT) and out.dtype == jnp.float32

    ref = hgnn_layer_reference(x, hyperedge_index, hyperedge_attr, params, num_edges=E)
    max_err = float(jnp.max(jnp.abs(out - ref)))
    assert max_err < 1e-1, f"max abs error vs f32 reference too large: {max_err}"

    print("KERNEL_OK")
</pallas_src>

<mosaic_0001>
module attributes {stable_mosaic.version = 11 : i64} {
  func.func @_pass1_kernel(%arg0: i32, %arg1: memref<16x128xf32, #tpu.memory_space<vmem>>, %arg2: memref<16x128xbf16, #tpu.memory_space<vmem>>, %arg3: memref<128x256xf32, #tpu.memory_space<vmem>>, %arg4: memref<128x1xf32, #tpu.memory_space<vmem>>, %arg5: memref<128x128xbf16, #tpu.memory_space<vmem>>, %arg6: memref<16x128xf32, #tpu.memory_space<vmem>>, %arg7: memref<128x128xf32, #tpu.memory_space<vmem>>) attributes {dimension_semantics = [#tpu.dimension_semantics<arbitrary>], iteration_bounds = array<i64: 1>, scalar_prefetch = 0 : i64, scratch_operands = 1 : i64, tpu.core_type = #tpu.core_type<tc>, window_params = [{transform_indices = @transform_0, window_bounds = array<i64: 16, 128>}, {transform_indices = @transform_1, window_bounds = array<i64: 16, 128>}, {pipeline_mode = #tpu.pipeline_mode<synchronous>, transform_indices = @transform_2, window_bounds = array<i64: 128, 256>}, {pipeline_mode = #tpu.pipeline_mode<synchronous>, transform_indices = @transform_3, window_bounds = array<i64: 128, 1>}, {pipeline_mode = #tpu.pipeline_mode<synchronous>, transform_indices = @transform_4, window_bounds = array<i64: 128, 128>}, {transform_indices = @transform_5, window_bounds = array<i64: 16, 128>}]} {
    %c0_i32 = arith.constant 0 : i32
    %0 = arith.cmpi eq, %arg0, %c0_i32 : i32
    %1 = arith.extui %0 : i1 to i32
    %c0_i32_0 = arith.constant 0 : i32
    %2 = arith.cmpi ne, %1, %c0_i32_0 : i32
    scf.if %2 {
      %cst_15 = arith.constant 0.000000e+00 : f32
      %18 = vector.broadcast %cst_15 : f32 to vector<128x128xf32>
      %c0_16 = arith.constant 0 : index
      %c0_17 = arith.constant 0 : index
      %19 = vector.load %arg7[%c0_16, %c0_17] : memref<128x128xf32, #tpu.memory_space<vmem>>, vector<128x128xf32>
      tpu.vector_store %arg7[%c0_16, %c0_17], %18 {strides = array<i32>} : memref<128x128xf32, #tpu.memory_space<vmem>>, vector<128x128xf32>,
    } else {
    }
    %c0 = arith.constant 0 : index
    %c0_1 = arith.constant 0 : index
    %3 = vector.load %arg1[%c0, %c0_1] : memref<16x128xf32, #tpu.memory_space<vmem>>, vector<16x128xf32>
    %c0_2 = arith.constant 0 : index
    %c0_3 = arith.constant 0 : index
    %4 = vector.load %arg3[%c0_2, %c0_3] : memref<128x256xf32, #tpu.memory_space<vmem>>, vector<128x256xf32>
    %cst = arith.constant dense<0.000000e+00> : vector<16x256xf32>
    %5 = tpu.matmul %3, %4, %cst {dimension_numbers = #tpu.dot_dimension_numbers<[1], [0], [0], [1], [0, 0, 1, 1], [], []>} : vector<16x128xf32>, vector<128x256xf32>, vector<16x256xf32> -> vector<16x256xf32>
    %6 = vector.extract_strided_slice %5 {offsets = [0, 128], sizes = [16, 128], strides = [1, 1]} : vector<16x256xf32> to vector<16x128xf32>
    %c0_4 = arith.constant 0 : index
    %c0_5 = arith.constant 0 : index
    %7 = vector.load %arg6[%c0_4, %c0_5] : memref<16x128xf32, #tpu.memory_space<vmem>>, vector<16x128xf32>
    tpu.vector_store %arg6[%c0_4, %c0_5], %6 {strides = array<i32>} : memref<16x128xf32, #tpu.memory_space<vmem>>, vector<16x128xf32>,
    %8 = vector.extract_strided_slice %5 {offsets = [0, 0], sizes = [16, 128], strides = [1, 1]} : vector<16x256xf32> to vector<16x128xf32>
    %9 = arith.truncf %8 : vector<16x128xf32> to vector<16x128xbf16>
    %c0_6 = arith.constant 0 : index
    %c0_7 = arith.constant 0 : index
    %10 = vector.load %arg7[%c0_6, %c0_7] : memref<128x128xf32, #tpu.memory_space<vmem>>, vector<128x128xf32>
    %c0_8 = arith.constant 0 : index
    %c0_9 = arith.constant 0 : index
    %11 = vector.load %arg2[%c0_8, %c0_9] : memref<16x128xbf16, #tpu.memory_space<vmem>>, vector<16x128xbf16>
    %cst_10 = arith.constant dense<0.000000e+00> : vector<128x128xf32>
    %12 = tpu.matmul %11, %9, %cst_10 {dimension_numbers = #tpu.dot_dimension_numbers<[0], [0], [1], [1], [0, 1, 1, 1], [], []>} : vector<16x128xbf16>, vector<16x128xbf16>, vector<128x128xf32> -> vector<128x128xf32>
    %13 = arith.addf %10, %12 : vector<128x128xf32>
    %c0_11 = arith.constant 0 : index
    %c0_12 = arith.constant 0 : index
    %14 = vector.load %arg7[%c0_11, %c0_12] : memref<128x128xf32, #tpu.memory_space<vmem>>, vector<128x128xf32>
    tpu.vector_store %arg7[%c0_11, %c0_12], %13 {strides = array<i32>} : memref<128x128xf32, #tpu.memory_space<vmem>>, vector<128x128xf32>,
    %c0_i32_13 = arith.constant 0 : i32
    %15 = arith.cmpi eq, %arg0, %c0_i32_13 : i32
    %16 = arith.extui %15 : i1 to i32
    %c0_i32_14 = arith.constant 0 : i32
    %17 = arith.cmpi ne, %16, %c0_i32_14 : i32
    scf.if %17 {
      %c0_15 = arith.constant 0 : index
      %c0_16 = arith.constant 0 : index
      %18 = vector.load %arg7[%c0_15, %c0_16] : memref<128x128xf32, #tpu.memory_space<vmem>>, vector<128x128xf32>
      %c0_17 = arith.constant 0 : index
      %c0_18 = arith.constant 0 : index
      %19 = vector.load %arg4[%c0_17, %c0_18] : memref<128x1xf32, #tpu.memory_space<vmem>>, vector<128x1xf32>
      %20 = vector.broadcast %19 : vector<128x1xf32> to vector<128x128xf32>
      %21 = arith.mulf %18, %20 : vector<128x128xf32>
      %22 = arith.truncf %21 : vector<128x128xf32> to vector<128x128xbf16>
      %c0_19 = arith.constant 0 : index
      %c0_20 = arith.constant 0 : index
      %23 = vector.load %arg5[%c0_19, %c0_20] : memref<128x128xbf16, #tpu.memory_space<vmem>>, vector<128x128xbf16>
      tpu.vector_store %arg5[%c0_19, %c0_20], %22 {strides = array<i32>} : memref<128x128xbf16, #tpu.memory_space<vmem>>, vector<128x128xbf16>,
    } else {
    }
    return
  }
  func.func @transform_0(%arg0: i32) -> (i32, i32) {
    %c0_i32 = arith.constant 0 : i32
    %c0_i32_0 = arith.constant 0 : i32
    return %arg0, %c0_i32 : i32, i32
  }
  func.func @transform_1(%arg0: i32) -> (i32, i32) {
    %c0_i32 = arith.constant 0 : i32
    %c0_i32_0 = arith.constant 0 : i32
    return %arg0, %c0_i32 : i32, i32
  }
  func.func @transform_2(%arg0: i32) -> (i32, i32) {
    %c0_i32 = arith.constant 0 : i32
    %c0_i32_0 = arith.constant 0 : i32
    %c0_i32_1 = arith.constant 0 : i32
    return %c0_i32, %c0_i32_0 : i32, i32
  }
  func.func @transform_3(%arg0: i32) -> (i32, i32) {
    %c0_i32 = arith.constant 0 : i32
    %c0_i32_0 = arith.constant 0 : i32
    %c0_i32_1 = arith.constant 0 : i32
    return %c0_i32, %c0_i32_0 : i32, i32
  }
  func.func @transform_4(%arg0: i32) -> (i32, i32) {
    %c0_i32 = arith.constant 0 : i32
    %c0_i32_0 = arith.constant 0 : i32
    %c0_i32_1 = arith.constant 0 : i32
    return %c0_i32, %c0_i32_0 : i32, i32
  }
  func.func @transform_5(%arg0: i32) -> (i32, i32) {
    %c0_i32 = arith.constant 0 : i32
    %c0_i32_0 = arith.constant 0 : i32
    return %arg0, %c0_i32 : i32, i32
  }
}

</mosaic_0001>

<bundles_post_ra>
// kernel: tpu_custom_call.1
= control target key start
LH: loop header
LB: loop body
LE: loop exit
PB: predicated region body
PF: predicated region fallthrough
CT: control target
= control target key end

     0   :  { %11 = vsyncpa [#allocation4], 0  ;;  %s985_s0 = inlined_call_operand.vmem [shape: f32[16,128], index: 0, kind: input, shape index: {}]   ;;  %s986_s1 = inlined_call_operand.vmem [shape: bf16[16,128], index: 1, kind: input, shape index: {}]   ;;  %s987_s2 = inlined_call_operand.hbm [shape: f32[128,256], index: 2, kind: input, shape index: {}]   ;;  %s988_s3 = inlined_call_operand.vmem [shape: f32[128,1], index: 3, kind: input, shape index: {}]   ;;  %s989_s4 = inlined_call_operand.hbm [shape: bf16[128,128], index: 4, kind: output, shape index: {0}]   ;;  %s990_s5 = inlined_call_operand.hbm [shape: f32[16,128], index: 5, kind: output, shape index: {1}]  }
   0x1   :  { %12 = vsyncpa [#allocation5], 0 }
   0x2   :  { %13 = vsyncpa [#allocation8], 0  ;;  %s841_s18 = smov [#allocation3]   ;;  %s769_s22 = scalar_lea.hbm %s987_s2, 4096 }
   0x3   :  { %s23_s19 = sshll.u32 %s841_s18, 4  ;;  %p770_p0 = scmp.ne.s32.totalorder %s987_s2, %s769_s22  ;;  %s24_s19 = int_to_ptr.vmem [resolvable:$true] %s23_s19 }
   0x4   :  { %p773_p1 = scmp.lt.u32.totalorder %s769_s22, %s987_s2 }
   0x6   :  { %p775_p2 = pnand %p773_p1, %p770_p0 }
   0x8   :  { %778 = shalt.err (!%p775_p2)
}
   0x9   :  { %s779_s27 = scalar_lea.vmem %s24_s19, 4096  ;;  %p784_p4 = scmp.lt.s32.totalorder %s24_s19, %s24_s19 }
   0xa   :  { %p780_p3 = scmp.ne.s32.totalorder %s24_s19, %s779_s27  ;;  %p785_p5 = scmp.lt.s32.totalorder %s779_s27, %s779_s27 }
   0xc   :  { %p786_p6 = por %p785_p5, %p784_p4 }
   0xe   :  { %p787_p7 = pnand %p786_p6, %p780_p3 }
  0x10   :  { %790 = shalt.err (!%p787_p7)
}
  0x11   :  { %s842_s28 = smov 256   ;;  %s843_s29 = smov 16  }
  0x12   :  { %29 = dma.hbm_to_vmem [thread:$0]  %s987_s2, 4096, %s24_s19, [#allocation4], %s842_s28, %s842_s28, %s843_s29  }
  0x13   :  { %835 = dma.done.wait [#allocation4], 4096  }
  0x14   :  { %836 = vsyncadd [#allocation4], 4294963200  ;;  %v844_v0 = vmov 0.0   ;;  %v59_v1 = vld [vmem:[#allocation3 + $0x8] sm:$0xff]  ;;  %v61_v2 = vld [vmem:[#allocation3 + $0x18] sm:$0xff]  ;;  %vm210_vm0 = vcmask 130048  }
  0x15   :  { %154 = vmatprep.mubr.f32.mxu0 %v844_v0  ;;  %v58_v3 = vld [vmem:[#allocation3] sm:$0xff]  ;;  %v723_v4 = vpack.c.bf16 %v61_v2, %v59_v1  ;;  %v60_v5 = vld [vmem:[#allocation3 + $0x10] sm:$0xff]  ;;  %v63_v6 = vld [vmem:[#allocation3 + $0x28] sm:$0xff]  ;;  %v845_v54 = vmov 0  }
  0x16   :  { %v65_v7 = vld [vmem:[#allocation3 + $0x38] sm:$0xff]  ;;  %v725_v8 = vpack.c.bf16 %v60_v5, %v58_v3  ;;  %v62_v10 = vld [vmem:[#allocation3 + $0x20] sm:$0xff]  ;;  %v64_v11 = vld [vmem:[#allocation3 + $0x30] sm:$0xff]  ;;  %767 = vset.pattern.permute.xlu1 %v845_v54 }
  0x17   :  { %v727_v9 = vpack.c.bf16 %v65_v7, %v63_v6  ;;  %v67_v12 = vld [vmem:[#allocation3 + $0x48] sm:$0xff]  ;;  %724 = vmatprep.subr.bf16.mxu0 %v723_v4  ;;  %v69_v13 = vld [vmem:[#allocation3 + $0x58] sm:$0xff]  ;;  %v729_v14 = vpack.c.bf16 %v64_v11, %v62_v10  ;;  %v66_v16 = vld [vmem:[#allocation3 + $0x40] sm:$0xff] }
  0x18   :  { %726 = vmatpush1.bf16.msra.mxu0 %v725_v8  ;;  %v731_v15 = vpack.c.bf16 %v69_v13, %v67_v12  ;;  %v68_v17 = vld [vmem:[#allocation3 + $0x50] sm:$0xff]  ;;  %v71_v18 = vld [vmem:[#allocation3 + $0x68] sm:$0xff]  ;;  %v73_v19 = vld [vmem:[#allocation3 + $0x78] sm:$0xff] }
  0x19   :  { %728 = vmatprep.subr.bf16.mxu0 %v727_v9  ;;  %v733_v20 = vpack.c.bf16 %v68_v17, %v66_v16  ;;  %v735_v21 = vpack.c.bf16 %v73_v19, %v71_v18  ;;  %v70_v22 = vld [vmem:[#allocation3 + $0x60] sm:$0xff]  ;;  %v72_v23 = vld [vmem:[#allocation3 + $0x70] sm:$0xff]  ;;  %v75_v24 = vld [vmem:[#allocation3 + $0x88] sm:$0xff] }
  0x1a   :  { %v77_v25 = vld [vmem:[#allocation3 + $0x98] sm:$0xff]  ;;  %v737_v26 = vpack.c.bf16 %v72_v23, %v70_v22  ;;  %v768_v27 = vld [vmem:[%s986_s1] sm:$0xff]   ;;  %v76_v30 = vld [vmem:[#allocation3 + $0x90] sm:$0xff] }
  0x1b   :  { %v739_v28 = vpack.c.bf16 %v77_v25, %v75_v24  ;;  %v74_v29 = vld [vmem:[#allocation3 + $0x80] sm:$0xff]  ;;  %v79_v31 = vld [vmem:[#allocation3 + $0xa8] sm:$0xff]  ;;  %v81_v32 = vld [vmem:[#allocation3 + $0xb8] sm:$0xff]  ;;  %194 = vxpose.xlu0.c.b16.start.end [1/1] (short) %v768_v27, 128 }
  0x1c   :  { %730 = vmatpush1.bf16.msra.mxu0 %v729_v14  ;;  %v741_v33 = vpack.c.bf16 %v76_v30, %v74_v29  ;;  %v743_v34 = vpack.c.bf16 %v81_v32, %v79_v31  ;;  %v78_v35 = vld [vmem:[#allocation3 + $0xa0] sm:$0xff]  ;;  %v80_v36 = vld [vmem:[#allocation3 + $0xb0] sm:$0xff]  ;;  %v83_v37 = vld [vmem:[#allocation3 + $0xc8] sm:$0xff] }
  0x1d   :  { %732 = vmatprep.subr.bf16.mxu0 %v731_v15  ;;  %v85_v38 = vld [vmem:[#allocation3 + $0xd8] sm:$0xff]  ;;  %v745_v39 = vpack.c.bf16 %v80_v36, %v78_v35  ;;  %v82_v41 = vld [vmem:[#allocation3 + $0xc0] sm:$0xff]  ;;  %v84_v42 = vld [vmem:[#allocation3 + $0xd0] sm:$0xff] }
  0x1e   :  { %v747_v40 = vpack.c.bf16 %v85_v38, %v83_v37  ;;  %v87_v43 = vld [vmem:[#allocation3 + $0xe8] sm:$0xff]  ;;  %v89_v44 = vld [vmem:[#allocation3 + $0xf8] sm:$0xff]  ;;  %v749_v45 = vpack.c.bf16 %v84_v42, %v82_v41  ;;  %v86_v47 = vld [vmem:[#allocation3 + $0xe0] sm:$0xff] }
  0x1f   :  { %v751_v46 = vpack.c.bf16 %v89_v44, %v87_v43  ;;  %v88_v48 = vld [vmem:[#allocation3 + $0xf0] sm:$0xff]  ;;  %v56_v50 = vld [vmem:[%s985_s0] sm:$0xff]  ;;  %v57_v51 = vld [vmem:[%s985_s0 + $0x8] sm:$0xff] }
  0x20   :  { %734 = vmatpush1.bf16.msra.mxu0 %v733_v20  ;;  %v753_v49 = vpack.c.bf16 %v88_v48, %v86_v47  ;;  %v384_v53 = vld [vmem:[%s988_s3 + $0x8] sm:$0xff]  ;;  %v385_v55 = vld [vmem:[%s988_s3 + $0x10] sm:$0xff]  ;;  %v386_v56 = vld [vmem:[%s988_s3 + $0x18] sm:$0xff] }
  0x21   :  { %736 = vmatprep.subr.bf16.mxu0 %v735_v21  ;;  %406 = vperm.xlu1 %767, %v384_v53   ;;  %v387_v57 = vld [vmem:[%s988_s3 + $0x20] sm:$0xff]  ;;  %v388_v58 = vld [vmem:[%s988_s3 + $0x28] sm:$0xff]  ;;  %v389_v61 = vld [vmem:[%s988_s3 + $0x30] sm:$0xff] }
  0x22   :  { %v383_v59 = vld [vmem:[%s988_s3] sm:$0xff]  ;;  %v397_v62 = vld [vmem:[%s988_s3 + $0x70] sm:$0xff]  ;;  %v390_v63 = vld [vmem:[%s988_s3 + $0x38] sm:$0xff] }
  0x23   :  { %v395_v60 = vld [vmem:[%s988_s3 + $0x60] sm:$0xff]  ;;  %v392_v1 = vld [vmem:[%s988_s3 + $0x48] sm:$0xff]  ;;  %v393_v2 = vld [vmem:[%s988_s3 + $0x50] sm:$0xff] }
  0x24   :  { %738 = vmatpush1.bf16.msra.mxu0 %v737_v26  ;;  %766 = vset.pattern.permute.xlu0 %v845_v54  ;;  %v394_v3 = vld [vmem:[%s988_s3 + $0x58] sm:$0xff]  ;;  %v396_v4 = vld [vmem:[%s988_s3 + $0x68] sm:$0xff] }
  0x25   :  { %740 = vmatprep.subr.bf16.mxu0 %v739_v28  ;;  %411 = vperm.xlu1 %767, %v385_v55   ;;  %v398_v5 = vld [vmem:[%s988_s3 + $0x78] sm:$0xff] }
  0x28   :  { %742 = vmatpush1.bf16.msra.mxu0 %v741_v33 }
  0x29   :  { %744 = vmatprep.subr.bf16.mxu0 %v743_v34  ;;  %416 = vperm.xlu1 %767, %v386_v56  }
  0x2c   :  { %746 = vmatpush1.bf16.msra.mxu0 %v745_v39 }
  0x2d   :  { %748 = vmatprep.subr.bf16.mxu0 %v747_v40  ;;  %421 = vperm.xlu1 %767, %v387_v57  }
  0x30   :  { %750 = vmatpush1.bf16.msra.mxu0 %v749_v45 }
  0x31   :  { %752 = vmatprep.subr.bf16.mxu0 %v751_v46  ;;  %426 = vperm.xlu1 %767, %v388_v58  }
  0x34   :  { %754 = vmatpush1.bf16.msra.mxu0 %v753_v49 }
  0x35   :  { %431 = vperm.xlu1 %767, %v389_v61  }
  0x37   :  { %155 = vmatmul.mubr.f32.vlgmr.msra.gmra.mrb[0].mxu0 %v56_v50 }
  0x38   :  { %160 = vmatprep.mubr.f32.mxu0 %v844_v0  ;;  %v391_v0 = vld [vmem:[%s988_s3 + $0x40] sm:$0xff]  ;;  %s846_s3 = smov [#allocation7]  }
  0x39   :  { %436 = vperm.xlu1 %767, %v390_v63   ;;  %s592_s15 = sshll.u32 %s846_s3, 4  ;;  %s593_s15 = int_to_ptr.vmem [resolvable:$true] %s592_s15 }
  0x3a   :  { %s791_s0 = scalar_lea.vmem %s593_s15, 256  ;;  %p796_p9 = scmp.lt.s32.totalorder %s593_s15, %s593_s15 }
  0x3b   :  { %161 = vmatmul.mubr.f32.gmra.mrb[2].mxu0 %v57_v51  ;;  %p792_p8 = scmp.ne.s32.totalorder %s593_s15, %s791_s0  ;;  %p797_p10 = scmp.lt.s32.totalorder %s791_s0, %s791_s0 }
  0x3d   :  { %441 = vperm.xlu1 %767, %v391_v0   ;;  %p798_p11 = por %p797_p10, %p796_p9 }
  0x3f   :  { %p799_p12 = pnand %p798_p11, %p792_p8 }
  0x40   :  { %401 = vperm.xlu0 %766, %v383_v59  }
  0x41   :  { %446 = vperm.xlu1 %767, %v392_v1  }
  0x44   :  { %461 = vperm.xlu0 %766, %v395_v60  }
  0x45   :  { %451 = vperm.xlu1 %767, %v393_v2  }
  0x48   :  { %471 = vperm.xlu0 %766, %v397_v62  }
  0x49   :  { %456 = vperm.xlu1 %767, %v394_v3  }
  0x4d   :  { %466 = vperm.xlu1 %767, %v396_v4  }
  0x51   :  { %476 = vperm.xlu1 %767, %v398_v5  }
  0x81   :  { %v202_v52 = vpop.trf.xlu0 }
  0x82   :  { %707 = vmatprep.mubr.msk.bf16.mxu1 %vm210_vm0, %v202_v52 }
  0x85   :  { %v203_v6 = vpop.trf.xlu0 }
  0x89   :  { %v204_v9 = vpop.trf.xlu0 }
  0x8d   :  { %v205_v13 = vpop.trf.xlu0 }
  0x91   :  { %v206_v14 = vpop.trf.xlu0 }
  0x95   :  { %v207_v15 = vpop.trf.xlu0 }
  0x99   :  { %v208_v16 = vpop.trf.xlu0 }
  0x9d   :  { %v209_v17 = vpop.trf.xlu0 }
 0x10a   :  { %v156_v7 = vpop.f32.mrb[0].mxu0 }
 0x10b   :  { %v158_v8 = vpop.f32.mrb[1].mxu0 }
 0x10c   :  { %167 = vst [vmem:[#allocation7] sm:$0xff] %v158_v8 }
 0x10e   :  { %v162_v10 = vpop.f32.mrb[2].mxu0 }
 0x10f   :  { %v169_v11 = vpack.c.bf16 %v162_v10, %v156_v7  ;;  %v164_v12 = vpop.f32.mrb[3].mxu0 }
 0x110   :  { %168 = vst [vmem:[#allocation7 + $0x8] sm:$0xff] %v164_v12 }
 0x111   :  { %705 = vmatprep.subr.bf16.mxu1 %v169_v11 }
 0x112   :  { %706 = vmatpush3.bf16.msra.mxu1 %v169_v11 }
 0x115   :  { %708 = vmatmul.mubr.msk.bf16.vlgmr.msra.gmra.mrb[0].mxu1 %vm210_vm0, %v203_v6 }
 0x116   :  { %711 = vmatprep.mubr.msk.bf16.mxu1 %vm210_vm0, %v204_v9 }
 0x11d   :  { %712 = vmatmul.mubr.msk.bf16.gmra.mrb[4].mxu1 %vm210_vm0, %v205_v13 }
 0x11e   :  { %715 = vmatprep.mubr.msk.bf16.mxu1 %vm210_vm0, %v206_v14 }
 0x125   :  { %716 = vmatmul.mubr.msk.bf16.gmra.mrb[8].mxu1 %vm210_vm0, %v207_v15 }
 0x126   :  { %719 = vmatprep.mubr.msk.bf16.mxu1 %vm210_vm0, %v208_v16 }
 0x12d   :  { %720 = vmatmul.mubr.msk.bf16.gmra.mrb[12].mxu1 %vm210_vm0, %v209_v17 }
 0x12e   :  { %802 = shalt.err (!%p799_p12)
}
 0x12f   :  { %s803_s18 = scalar_lea.hbm %s990_s5, 256 }
 0x130   :  { %p804_p13 = scmp.ne.s32.totalorder %s990_s5, %s803_s18  ;;  %p807_p0 = scmp.lt.u32.totalorder %s803_s18, %s990_s5 }
 0x132   :  { %p809_p1 = pnand %p807_p0, %p804_p13 }
 0x134   :  { %812 = shalt.err (!%p809_p1)
}
 0x135   :  { %s847_s23 = smov 128   ;;  %s848_s24 = smov 8   ;;  %v407_v18 = vpop.permute.xlu1 %406  ;;  %v402_v28 = vpop.permute.xlu0 %401 }
 0x136   :  { %598 = dma.vmem_to_hbm [thread:$0]  %s593_s15, 256, %s990_s5, [#allocation8], %s847_s23, %s847_s23, %s848_s24  }
 0x137   :  { %s849_s5 = smov [#allocation6]  }
 0x138   :  { %s580_s27 = sshll.u32 %s849_s5, 4  ;;  %s581_s27 = int_to_ptr.vmem [resolvable:$true] %s580_s27 }
 0x139   :  { %v412_v19 = vpop.permute.xlu1 %411  ;;  %v462_v57 = vpop.permute.xlu0 %461  ;;  %s813_s28 = scalar_lea.vmem %s581_s27, 1024  ;;  %p818_p3 = scmp.lt.s32.totalorder %s581_s27, %s581_s27 }
 0x13a   :  { %p814_p2 = scmp.ne.s32.totalorder %s581_s27, %s813_s28  ;;  %p819_p4 = scmp.lt.s32.totalorder %s813_s28, %s813_s28 }
 0x13c   :  { %p820_p5 = por %p819_p4, %p818_p3 }
 0x13d   :  { %v417_v20 = vpop.permute.xlu1 %416  ;;  %v472_v1 = vpop.permute.xlu0 %471 }
 0x13e   :  { %p821_p6 = pnand %p820_p5, %p814_p2 }
 0x141   :  { %v422_v21 = vpop.permute.xlu1 %421 }
 0x145   :  { %v427_v22 = vpop.permute.xlu1 %426 }
 0x149   :  { %v432_v23 = vpop.permute.xlu1 %431 }
 0x14d   :  { %v437_v24 = vpop.permute.xlu1 %436 }
 0x151   :  { %v442_v25 = vpop.permute.xlu1 %441 }
 0x155   :  { %v447_v26 = vpop.permute.xlu1 %446 }
 0x159   :  { %v452_v38 = vpop.permute.xlu1 %451 }
 0x15d   :  { %v457_v47 = vpop.permute.xlu1 %456 }
 0x161   :  { %v467_v53 = vpop.permute.xlu1 %466 }
 0x165   :  { %v477_v63 = vpop.permute.xlu1 %476 }
 0x1e8   :  { %v709_v27 = vpop.f32.mrb[0].mxu1 }
 0x1e9   :  { %v269_v29 = vpop.f32.mrb[1].mxu1  ;;  %v481_v31 = vmul.f32 %v709_v27, %v412_v19 }
 0x1ea   :  { %v710_v30 = vpop.f32.mrb[2].mxu1  ;;  %v479_v34 = vmul.f32 %v402_v28, %v269_v29 }
 0x1eb   :  { %v482_v32 = vmul.f32 %v710_v30, %v417_v20  ;;  %v272_v33 = vpop.f32.mrb[3].mxu1 }
 0x1ec   :  { %v480_v35 = vmul.f32 %v407_v18, %v272_v33 }
 0x1ed   :  { %v657_v36 = vpack.c.bf16 %v482_v32, %v481_v31 }
 0x1ee   :  { %v652_v37 = vpack.c.bf16 %v480_v35, %v479_v34 }
 0x1ef   :  { %689 = vst [vmem:[#allocation6 + $0x8] sm:$0xff] %v657_v36  }
 0x1f0   :  { %653 = vst [vmem:[#allocation6] sm:$0xff] %v652_v37   ;;  %v713_v39 = vpop.f32.mrb[4].mxu1 }
 0x1f1   :  { %v285_v40 = vpop.f32.mrb[5].mxu1  ;;  %v485_v42 = vmul.f32 %v713_v39, %v432_v23 }
 0x1f2   :  { %v714_v41 = vpop.f32.mrb[6].mxu1  ;;  %v483_v45 = vmul.f32 %v422_v21, %v285_v40 }
 0x1f3   :  { %v486_v43 = vmul.f32 %v714_v41, %v437_v24  ;;  %v288_v44 = vpop.f32.mrb[7].mxu1 }
 0x1f4   :  { %v484_v46 = vmul.f32 %v427_v22, %v288_v44 }
 0x1f5   :  { %v667_v48 = vpack.c.bf16 %v486_v43, %v485_v42 }
 0x1f6   :  { %v662_v49 = vpack.c.bf16 %v484_v46, %v483_v45 }
 0x1f7   :  { %691 = vst [vmem:[#allocation6 + $0x18] sm:$0xff] %v667_v48  }
 0x1f8   :  { %690 = vst [vmem:[#allocation6 + $0x10] sm:$0xff] %v662_v49   ;;  %v717_v50 = vpop.f32.mrb[8].mxu1 }
 0x1f9   :  { %v301_v51 = vpop.f32.mrb[9].mxu1  ;;  %v489_v54 = vmul.f32 %v717_v50, %v452_v38 }
 0x1fa   :  { %v718_v52 = vpop.f32.mrb[10].mxu1  ;;  %v487_v58 = vmul.f32 %v442_v25, %v301_v51 }
 0x1fb   :  { %v490_v55 = vmul.f32 %v718_v52, %v457_v47  ;;  %v304_v56 = vpop.f32.mrb[11].mxu1 }
 0x1fc   :  { %v488_v59 = vmul.f32 %v447_v26, %v304_v56 }
 0x1fd   :  { %v677_v60 = vpack.c.bf16 %v490_v55, %v489_v54 }
 0x1fe   :  { %v672_v61 = vpack.c.bf16 %v488_v59, %v487_v58 }
 0x1ff   :  { %693 = vst [vmem:[#allocation6 + $0x28] sm:$0xff] %v677_v60  }
 0x200   :  { %692 = vst [vmem:[#allocation6 + $0x20] sm:$0xff] %v672_v61   ;;  %v721_v62 = vpop.f32.mrb[12].mxu1 }
 0x201   :  { %v317_v0 = vpop.f32.mrb[13].mxu1  ;;  %v493_v3 = vmul.f32 %v721_v62, %v472_v1 }
 0x202   :  { %v722_v2 = vpop.f32.mrb[14].mxu1  ;;  %v491_v6 = vmul.f32 %v462_v57, %v317_v0 }
 0x203   :  { %v494_v4 = vmul.f32 %v722_v2, %v477_v63  ;;  %v320_v5 = vpop.f32.mrb[15].mxu1 }
 0x204   :  { %v492_v7 = vmul.f32 %v467_v53, %v320_v5 }
 0x205   :  { %v687_v8 = vpack.c.bf16 %v494_v4, %v493_v3 }
 0x206   :  { %v682_v9 = vpack.c.bf16 %v492_v7, %v491_v6 }
 0x207   :  { %695 = vst [vmem:[#allocation6 + $0x38] sm:$0xff] %v687_v8  }
 0x208   :  { %694 = vst [vmem:[#allocation6 + $0x30] sm:$0xff] %v682_v9  }
 0x209   :  { %824 = shalt.err (!%p821_p6)
}
 0x20a   :  { %s825_s6 = scalar_lea.hbm %s989_s4, 1024 }
 0x20b   :  { %p826_p7 = scmp.ne.s32.totalorder %s989_s4, %s825_s6  ;;  %p829_p8 = scmp.lt.u32.totalorder %s825_s6, %s989_s4 }
 0x20d   :  { %p831_p9 = pnand %p829_p8, %p826_p7 }
 0x20f   :  { %834 = shalt.err (!%p831_p9)
}
 0x210   :  { %s850_s9 = smov 64   ;;  %s851_s10 = smov 4  }
 0x211   :  { %586 = dma.vmem_to_hbm [thread:$0]  %s581_s27, 1024, %s989_s4, [#allocation5], %s850_s9, %s850_s9, %s851_s10  }
 0x212   :  { %837 = dma.done.wait [#allocation5], 1024  }
 0x213   :  { %838 = vsyncadd [#allocation5], 4294966272 }
 0x214   :  { %839 = dma.done.wait [#allocation8], 256  }
 0x215   :  { %840 = vsyncadd [#allocation8], 4294967040 }
 0x216   :  { %605 = vsyncpa [#allocation4], 1 }
 0x217   :  { %606 = vsyncpa [#allocation5], 1 }
 0x218   :  { %607 = vsyncpa [#allocation8], 1 }

</bundles_post_ra>
